<compile_context>
chip_gen: v7x
topology: tpu7x:2x2x1
jax: 0.10.0
libtpu: 0.0.40
codegen_flags: <defaults>
</compile_context>

<pallas_src>
import functools

import jax
import jax.numpy as jnp
from jax import lax
from jax.experimental import pallas as pl
from jax.experimental.pallas import tpu as pltpu

LANE = 128                  # vreg lane width
SUB = 8                     # vreg sublane count
MAX_TILE_M = 32             # rows per block (keeps (tile_m,128) accumulators in vregs)
TARGET_ELEMS = 512 * 1024   # elements per input per grid step (~2 MiB in f32)
STATIC_UNROLL_MAX = 16      # fully unroll chunk loops up to this many chunks


def _powp(v, p):
    """x**p with torch.pow semantics (no silent int truncation of p)."""
    if p == 2:
        return v * v                      # pure-VPU fast path
    pf = float(p)
    if pf.is_integer():
        return v ** int(pf)               # integer_pow -> mul chain
    return v ** pf                        # pow -> EUP exp/log


def _dice_partial_kernel(x_ref, t_ref, num_ref, den_ref, *, p, tile_m, tile_w,
                         d_blocks, last_full_chunks, last_rem):
    """Per-row, lane-wide partial sums of x*t and x**p + t**p for one block.

    Block shapes: x_ref/t_ref are (tile_m, tile_w); outputs are (1, tile_m, LANE)
    f32 lane partials.  The wrapper finishes the (tiny) reduction.
    """

    def chunk_update(q, carry):
        pn, pd = carry
        off = q * LANE
        if not isinstance(off, int):
            off = pl.multiple_of(off, LANE)
        xs = x_ref[:, pl.ds(off, LANE)].astype(jnp.float32)
        ts = t_ref[:, pl.ds(off, LANE)].astype(jnp.float32)
        pn = pn + xs * ts
        pd = pd + (_powp(xs, p) + _powp(ts, p))
        return pn, pd

    def accum(n_chunks):
        zeros = jnp.zeros((tile_m, LANE), jnp.float32)
        carry = (zeros, zeros)
        if n_chunks <= 0:
            return carry
        if n_chunks <= STATIC_UNROLL_MAX:
            for q in range(n_chunks):          # fully static unroll
                carry = chunk_update(q, carry)
            return carry
        unroll = 8
        main = (n_chunks // unroll) * unroll
        carry = lax.fori_loop(0, main, chunk_update, carry, unroll=unroll)
        for q in range(main, n_chunks):        # static remainder (< unroll iters)
            carry = chunk_update(q, carry)
        return carry

    def emit(pn, pd):
        num_ref[0] = pn
        den_ref[0] = pd

    if tile_w < LANE:
        # Tiny feature width (< one lane group): single narrow block.  Put the
        # per-row sums into lane 0 (wrapper sums over lanes anyway).
        xs = x_ref[...].astype(jnp.float32)
        ts = t_ref[...].astype(jnp.float32)
        lane = lax.broadcasted_iota(jnp.int32, (tile_m, LANE), 1)
        num = jnp.sum(xs * ts, axis=1, keepdims=True)
        den = jnp.sum(_powp(xs, p) + _powp(ts, p), axis=1, keepdims=True)
        num_ref[0] = jnp.where(lane == 0, num, 0.0)
        den_ref[0] = jnp.where(lane == 0, den, 0.0)
        return

    main_chunks = tile_w // LANE
    has_tail = (last_full_chunks != main_chunks) or (last_rem > 0)

    def full_block():
        emit(*accum(main_chunks))

    def tail_block():
        # Last column block: fewer valid 128-chunks, plus an optional lane
        # masked remainder chunk (only path that pays for masking).
        pn, pd = accum(last_full_chunks)
        if last_rem:
            off = last_full_chunks * LANE
            xs = x_ref[:, pl.ds(off, LANE)].astype(jnp.float32)
            ts = t_ref[:, pl.ds(off, LANE)].astype(jnp.float32)
            lane = lax.broadcasted_iota(jnp.int32, (tile_m, LANE), 1)
            valid = lane < last_rem
            xs = jnp.where(valid, xs, 0.0)
            ts = jnp.where(valid, ts, 0.0)
            pn = pn + xs * ts
            pd = pd + (_powp(xs, p) + _powp(ts, p))
        emit(pn, pd)

    if not has_tail:
        full_block()
    elif d_blocks == 1:
        tail_block()
    else:
        r = pl.program_id(1)

        @pl.when(r < d_blocks - 1)
        def _():
            full_block()

        @pl.when(r == d_blocks - 1)
        def _():
            tail_block()


def _pick_group(n, d):
    """Rows-per-sample G so each sample is viewed as G rows of width D // G
    (a multiple of LANE).  Keeps blocks sublane-dense for tiny batches."""
    if n >= SUB or d < 2 * LANE or d % LANE != 0:
        return 1
    k = d // LANE
    want = -(-SUB // n)                    # ceil(SUB / n)
    best = 1
    for g in range(1, min(k, 256) + 1):
        if k % g == 0:
            best = g
            if g >= want:
                break
    return best


def _choose_tiles(m, w):
    # Rows per block: multiple of 8 (or the full row count when m < 8).
    if m <= SUB:
        tile_m = m
    else:
        tile_m = max(SUB, min(MAX_TILE_M, (m // SUB) * SUB))
    # Columns per block: multiple of 128, sized for ~2 MiB (f32) per input per
    # grid step, accounting for sublane padding when tile_m < 8.
    if w < LANE:
        tile_w = w
    else:
        max_chunks = w // LANE
        want_chunks = max(1, TARGET_ELEMS // (LANE * max(tile_m, SUB)))
        tile_w = LANE * min(max_chunks, want_chunks)
    return tile_m, tile_w


def binary_dice_loss(inputs, target, *, smooth=1.0, p=2, reduction="mean"):
    assert inputs.shape[0] == target.shape[0], "inputs and target batch size dont match"
    n = inputs.shape[0]
    d = 1
    for s in inputs.shape[1:]:
        d *= s

    # Keep native (possibly bf16) float dtypes: the kernel upcasts in-register,
    # so narrow inputs directly cut HBM traffic.  Non-float masks go to f32.
    x = inputs.reshape(n, d)
    t = target.reshape(n, d)
    if not jnp.issubdtype(x.dtype, jnp.floating):
        x = x.astype(jnp.float32)
    if not jnp.issubdtype(t.dtype, jnp.floating):
        t = t.astype(jnp.float32)

    g = _pick_group(n, d)
    w = d // g
    m = n * g
    x = x.reshape(m, w)          # free row-major views; no jnp.pad copies anywhere
    t = t.reshape(m, w)

    tile_m, tile_w = _choose_tiles(m, w)
    m_blocks = pl.cdiv(m, tile_m)
    d_blocks = pl.cdiv(w, tile_w)
    tail_w = w - (d_blocks - 1) * tile_w
    last_full_chunks = tail_w // LANE
    last_rem = tail_w % LANE

    kernel = functools.partial(
        _dice_partial_kernel, p=p, tile_m=tile_m, tile_w=tile_w,
        d_blocks=d_blocks, last_full_chunks=last_full_chunks, last_rem=last_rem)

    out_shape = (jax.ShapeDtypeStruct((d_blocks, m, LANE), jnp.float32),
                 jax.ShapeDtypeStruct((d_blocks, m, LANE), jnp.float32))
    out_spec = pl.BlockSpec((1, tile_m, LANE), lambda i, r: (r, i, 0))

    # TODO(synk): optionally add pipeline_mode=pl.Buffered(3) on the input specs
    # (low-single-digit % on v5e/v6e per review); left at default depth for
    # maximum robustness across jax versions.
    num_out, den_out = pl.pallas_call(
        kernel,
        out_shape=out_shape,
        grid_spec=pltpu.PrefetchScalarGridSpec(
            num_scalar_prefetch=0,
            grid=(m_blocks, d_blocks),
            in_specs=[pl.BlockSpec((tile_m, tile_w), lambda i, r: (i, r)),
                      pl.BlockSpec((tile_m, tile_w), lambda i, r: (i, r))],
            out_specs=[out_spec, out_spec],
        ),
        compiler_params=pltpu.CompilerParams(
            # No cross-step state -> both axes truly parallel (feeds both v7x TCs
            # even when there is a single batch block).
            dimension_semantics=("parallel", "parallel"),
            vmem_limit_bytes=32 << 20,
        ),
    )(x, t)

    # Tiny finalize in plain JAX: sum lane partials over column blocks, lanes,
    # and row-groups, then the dice ratio and the requested reduction.
    num = 2.0 * jnp.sum(num_out, axis=(0, 2)).reshape(n, g).sum(axis=1) + smooth
    den = jnp.sum(den_out, axis=(0, 2)).reshape(n, g).sum(axis=1) + smooth
    loss = 1.0 - num / den
    if reduction == "mean":
        return jnp.mean(loss)
    if reduction == "sum":
        return jnp.sum(loss)
    return loss
    # TODO(synk): for the (huge n, D < ~1K) regime the 32-row block cap leaves
    # per-step overhead exposed; a VMEM-scratch accumulator variant would lift it.


def _reference(inputs, target, smooth=1.0, p=2, reduction="mean"):
    n = inputs.shape[0]
    x = inputs.reshape(n, -1).astype(jnp.float32)
    t = target.reshape(n, -1).astype(jnp.float32)
    num = 2.0 * jnp.sum(x * t, axis=1) + smooth
    den = jnp.sum(x ** p + t ** p, axis=1) + smooth
    loss = 1.0 - num / den
    if reduction == "mean":
        return jnp.mean(loss)
    if reduction == "sum":
        return jnp.sum(loss)
    return loss


if __name__ == "__main__":
    key = jax.random.PRNGKey(0)
    k1, k2, k3, k4, k5, k6 = jax.random.split(key, 6)

    # Case 1: canonical NCHW probabilities vs binary mask (bf16 target -> half its HBM traffic).
    x1 = jax.nn.sigmoid(jax.random.normal(k1, (2, 4, 16, 16), jnp.float32))
    t1 = (jax.random.uniform(k2, (2, 4, 16, 16)) > 0.5).astype(jnp.bfloat16)
    out1 = jax.block_until_ready(binary_dice_loss(x1, t1, smooth=1, p=2, reduction="mean"))
    ref1 = _reference(x1, t1, smooth=1.0, p=2, reduction="mean")
    assert jnp.allclose(out1, ref1, rtol=1e-4, atol=1e-6), (out1, ref1)

    # reduction='none' (same kernel, wrapper-only change).
    out1n = jax.block_until_ready(binary_dice_loss(x1, t1, reduction="none"))
    ref1n = _reference(x1, t1, reduction="none")
    assert jnp.allclose(out1n, ref1n, rtol=1e-4, atol=1e-6), (out1n, ref1n)

    # Non-default p (guards the generic-p path; p is no longer truncated).
    out1p = jax.block_until_ready(binary_dice_loss(x1, t1, p=3))
    ref1p = _reference(x1, t1, p=3)
    assert jnp.allclose(out1p, ref1p, rtol=1e-4, atol=1e-6), (out1p, ref1p)

    # Case 2: feature size not a multiple of 128 -> in-kernel lane-tail masking, no pad copy.
    x2 = jax.random.uniform(k3, (2, 3, 7, 9), jnp.float32)
    t2 = (jax.random.uniform(k4, (2, 3, 7, 9)) > 0.5).astype(jnp.float32)
    out2 = jax.block_until_ready(binary_dice_loss(x2, t2))
    ref2 = _reference(x2, t2)
    assert jnp.allclose(out2, ref2, rtol=1e-4, atol=1e-6), (out2, ref2)

    # Case 3: larger feature dim, bf16 x and t -> fori_loop chunk path + row grouping.
    x3 = jax.nn.sigmoid(jax.random.normal(k5, (4, 8, 32, 32), jnp.bfloat16))
    t3 = (jax.random.uniform(k6, (4, 8, 32, 32)) > 0.5).astype(jnp.bfloat16)
    out3 = jax.block_until_ready(binary_dice_loss(x3, t3))
    ref3 = _reference(x3, t3)
    assert jnp.allclose(out3, ref3, rtol=1e-4, atol=1e-6), (out3, ref3)

    print("KERNEL_OK")
</pallas_src>

<mosaic_0001>
module attributes {stable_mosaic.version = 11 : i64} {
  func.func @_dice_partial_kernel(%arg0: i32, %arg1: i32, %arg2: memref<8x256xf32, #tpu.memory_space<vmem>>, %arg3: memref<8x256xbf16, #tpu.memory_space<vmem>>, %arg4: memref<1x8x128xf32, #tpu.memory_space<vmem>>, %arg5: memref<1x8x128xf32, #tpu.memory_space<vmem>>) attributes {dimension_semantics = [#tpu.dimension_semantics<parallel>, #tpu.dimension_semantics<parallel>], iteration_bounds = array<i64: 1, 1>, scalar_prefetch = 0 : i64, scratch_operands = 0 : i64, tpu.core_type = #tpu.core_type<tc>, window_params = [{transform_indices = @transform_0, window_bounds = array<i64: 8, 256>}, {transform_indices = @transform_1, window_bounds = array<i64: 8, 256>}, {transform_indices = @transform_2, window_bounds = array<i64: 1, 8, 128>}, {transform_indices = @transform_3, window_bounds = array<i64: 1, 8, 128>}]} {
    %cst = arith.constant 0.000000e+00 : f32
    %0 = vector.broadcast %cst : f32 to vector<8x128xf32>
    %c0 = arith.constant 0 : index
    %c0_0 = arith.constant 0 : index
    %1 = vector.load %arg2[%c0, %c0_0] : memref<8x256xf32, #tpu.memory_space<vmem>>, vector<8x128xf32>
    %c0_1 = arith.constant 0 : index
    %c0_2 = arith.constant 0 : index
    %2 = vector.load %arg3[%c0_1, %c0_2] : memref<8x256xbf16, #tpu.memory_space<vmem>>, vector<8x128xbf16>
    %3 = arith.extf %2 : vector<8x128xbf16> to vector<8x128xf32>
    %4 = arith.mulf %1, %3 : vector<8x128xf32>
    %5 = arith.addf %0, %4 : vector<8x128xf32>
    %6 = arith.mulf %1, %1 : vector<8x128xf32>
    %7 = arith.mulf %3, %3 : vector<8x128xf32>
    %8 = arith.addf %6, %7 : vector<8x128xf32>
    %9 = arith.addf %0, %8 : vector<8x128xf32>
    %c0_3 = arith.constant 0 : index
    %c128 = arith.constant 128 : index
    %10 = vector.load %arg2[%c0_3, %c128] : memref<8x256xf32, #tpu.memory_space<vmem>>, vector<8x128xf32>
    %c0_4 = arith.constant 0 : index
    %c128_5 = arith.constant 128 : index
    %11 = vector.load %arg3[%c0_4, %c128_5] : memref<8x256xbf16, #tpu.memory_space<vmem>>, vector<8x128xbf16>
    %12 = arith.extf %11 : vector<8x128xbf16> to vector<8x128xf32>
    %13 = arith.mulf %10, %12 : vector<8x128xf32>
    %14 = arith.addf %5, %13 : vector<8x128xf32>
    %15 = arith.mulf %10, %10 : vector<8x128xf32>
    %16 = arith.mulf %12, %12 : vector<8x128xf32>
    %17 = arith.addf %15, %16 : vector<8x128xf32>
    %18 = arith.addf %9, %17 : vector<8x128xf32>
    %c0_6 = arith.constant 0 : index
    %c0_7 = arith.constant 0 : index
    %c0_8 = arith.constant 0 : index
    %19 = vector.load %arg4[%c0_6, %c0_7, %c0_8] : memref<1x8x128xf32, #tpu.memory_space<vmem>>, vector<1x8x128xf32>
    %20 = vector.shape_cast %19 : vector<1x8x128xf32> to vector<8x128xf32>
    %21 = vector.shape_cast %14 : vector<8x128xf32> to vector<1x8x128xf32>
    tpu.vector_store %arg4[%c0_6, %c0_7, %c0_8], %21 {strides = array<i32>} : memref<1x8x128xf32, #tpu.memory_space<vmem>>, vector<1x8x128xf32>,
    %c0_9 = arith.constant 0 : index
    %c0_10 = arith.constant 0 : index
    %c0_11 = arith.constant 0 : index
    %22 = vector.load %arg5[%c0_9, %c0_10, %c0_11] : memref<1x8x128xf32, #tpu.memory_space<vmem>>, vector<1x8x128xf32>
    %23 = vector.shape_cast %22 : vector<1x8x128xf32> to vector<8x128xf32>
    %24 = vector.shape_cast %18 : vector<8x128xf32> to vector<1x8x128xf32>
    tpu.vector_store %arg5[%c0_9, %c0_10, %c0_11], %24 {strides = array<i32>} : memref<1x8x128xf32, #tpu.memory_space<vmem>>, vector<1x8x128xf32>,
    return
  }
  func.func @transform_0(%arg0: i32, %arg1: i32) -> (i32, i32) {
    %c0_i32 = arith.constant 0 : i32
    return %arg0, %arg1 : i32, i32
  }
  func.func @transform_1(%arg0: i32, %arg1: i32) -> (i32, i32) {
    %c0_i32 = arith.constant 0 : i32
    return %arg0, %arg1 : i32, i32
  }
  func.func @transform_2(%arg0: i32, %arg1: i32) -> (i32, i32, i32) {
    %c0_i32 = arith.constant 0 : i32
    %c0_i32_0 = arith.constant 0 : i32
    return %arg1, %arg0, %c0_i32 : i32, i32, i32
  }
  func.func @transform_3(%arg0: i32, %arg1: i32) -> (i32, i32, i32) {
    %c0_i32 = arith.constant 0 : i32
    %c0_i32_0 = arith.constant 0 : i32
    return %arg1, %arg0, %c0_i32 : i32, i32, i32
  }
}

</mosaic_0001>

<bundles_post_ra>
// kernel: tpu_custom_call.1
= control target key start
LH: loop header
LB: loop body
LE: loop exit
PB: predicated region body
PF: predicated region fallthrough
CT: control target
= control target key end

     0   :  { %9 = vsyncpa [#allocation3], 0  ;;  %s261_s0 = inlined_call_operand.hbm [shape: f32[8,256], index: 0, kind: input, shape index: {}]   ;;  %s262_s1 = inlined_call_operand.hbm [shape: bf16[8,256], index: 1, kind: input, shape index: {}]   ;;  %s263_s2 = inlined_call_operand.hbm [shape: f32[1,8,128], index: 2, kind: output, shape index: {0}]   ;;  %s264_s3 = inlined_call_operand.hbm [shape: f32[1,8,128], index: 3, kind: output, shape index: {1}]  }
   0x1   :  { %10 = vsyncpa [#allocation6], 0 }
   0x2   :  { %11 = vsyncpa [#allocation4], 0 }
   0x3   :  { %12 = vsyncpa [#allocation9], 0  ;;  %s189_s12 = smov [#allocation2]   ;;  %s190_s14 = smov [#allocation5]  }
   0x4   :  { %s19_s13 = sshll.u32 %s189_s12, 4  ;;  %s29_s15 = sshll.u32 %s190_s14, 4  ;;  %s20_s13 = int_to_ptr.vmem [resolvable:$true] %s19_s13  ;;  %s30_s15 = int_to_ptr.vmem [resolvable:$true] %s29_s15 }
   0x5   :  { %s93_s18 = scalar_lea.hbm %s261_s0, 256 }
   0x6   :  { %p94_p0 = scmp.ne.s32.totalorder %s261_s0, %s93_s18  ;;  %p97_p1 = scmp.lt.u32.totalorder %s93_s18, %s261_s0 }
   0x8   :  { %p99_p2 = pnand %p97_p1, %p94_p0 }
   0xa   :  { %102 = shalt.err (!%p99_p2)
}
   0xb   :  { %s103_s23 = scalar_lea.vmem %s20_s13, 256  ;;  %p108_p4 = scmp.lt.s32.totalorder %s20_s13, %s20_s13 }
   0xc   :  { %p104_p3 = scmp.ne.s32.totalorder %s20_s13, %s103_s23  ;;  %p109_p5 = scmp.lt.s32.totalorder %s103_s23, %s103_s23 }
   0xe   :  { %p110_p6 = por %p109_p5, %p108_p4 }
  0x10   :  { %p111_p7 = pnand %p110_p6, %p104_p3 }
  0x12   :  { %114 = shalt.err (!%p111_p7)
}
  0x13   :  { %22 = dma.hbm_to_vmem [thread:$0]  %s261_s0, 256, %s20_s13, [#allocation3]  }
  0x14   :  { %s115_s28 = scalar_lea.hbm %s262_s1, 128 }
  0x15   :  { %p116_p8 = scmp.ne.s32.totalorder %s262_s1, %s115_s28  ;;  %p119_p9 = scmp.lt.u32.totalorder %s115_s28, %s262_s1 }
  0x17   :  { %p121_p10 = pnand %p119_p9, %p116_p8 }
  0x19   :  { %124 = shalt.err (!%p121_p10)
}
  0x1a   :  { %s125_s6 = scalar_lea.vmem %s30_s15, 128  ;;  %p130_p12 = scmp.lt.s32.totalorder %s30_s15, %s30_s15 }
  0x1b   :  { %p126_p11 = scmp.ne.s32.totalorder %s30_s15, %s125_s6  ;;  %p131_p13 = scmp.lt.s32.totalorder %s125_s6, %s125_s6 }
  0x1d   :  { %p132_p0 = por %p131_p13, %p130_p12 }
  0x1f   :  { %p133_p1 = pnand %p132_p0, %p126_p11 }
  0x21   :  { %136 = shalt.err (!%p133_p1)
}
  0x22   :  { %32 = dma.hbm_to_vmem [thread:$0]  %s262_s1, 128, %s30_s15, [#allocation6]  }
  0x23   :  { %181 = dma.done.wait [#allocation3], 256  }
  0x24   :  { %182 = vsyncadd [#allocation3], 4294967040 }
  0x25   :  { %183 = dma.done.wait [#allocation6], 128  }
  0x26   :  { %184 = vsyncadd [#allocation6], 4294967168  ;;  %v39_v0 = vld [vmem:[#allocation2] sm:$0xff]  ;;  %v40_v1 = vld [vmem:[#allocation5] sm:$0xff]   ;;  %s191_s8 = smov [#allocation7]   ;;  %s192_s10 = smov [#allocation8]  }
  0x27   :  { %v48_v2 = vld [vmem:[#allocation2 + $0x8] sm:$0xff]  ;;  %v41_v3 = vunpack.c.l.bf16 %v40_v1  ;;  %v50_v4 = vunpack.c.h.bf16 %v40_v1  ;;  %v44_v5 = vmul.f32 %v39_v0, %v39_v0  ;;  %s65_s9 = sshll.u32 %s191_s8, 4  ;;  %s75_s11 = sshll.u32 %s192_s10, 4  ;;  %s66_s9 = int_to_ptr.vmem [resolvable:$true] %s65_s9  ;;  %s76_s11 = int_to_ptr.vmem [resolvable:$true] %s75_s11 }
  0x28   :  { %v53_v6 = vmul.f32 %v48_v2, %v48_v2  ;;  %s137_s1 = scalar_lea.vmem %s66_s9, 128  ;;  %p142_p3 = scmp.lt.s32.totalorder %s66_s9, %s66_s9 }
  0x29   :  { %v42_v7 = vmul.f32 %v41_v3, %v39_v0  ;;  %v51_v8 = vmul.f32 %v50_v4, %v48_v2  ;;  %v45_v9 = vmul.f32 %v41_v3, %v41_v3  ;;  %v54_v10 = vmul.f32 %v50_v4, %v50_v4  ;;  %p138_p2 = scmp.ne.s32.totalorder %s66_s9, %s137_s1  ;;  %p143_p4 = scmp.lt.s32.totalorder %s137_s1, %s137_s1 }
  0x2b   :  { %v52_v11 = vadd.f32 %v51_v8, %v42_v7  ;;  %v46_v12 = vadd.f32 %v45_v9, %v44_v5  ;;  %v55_v13 = vadd.f32 %v54_v10, %v53_v6  ;;  %p144_p5 = por %p143_p4, %p142_p3 }
  0x2d   :  { %57 = vst [vmem:[#allocation7] sm:$0xff] %v52_v11  ;;  %v56_v14 = vadd.f32 %v55_v13, %v46_v12  ;;  %p145_p6 = pnand %p144_p5, %p138_p2 }
  0x2f   :  { %148 = shalt.err (!%p145_p6)
}
  0x30   :  { %s149_s14 = scalar_lea.hbm %s263_s2, 128 }
  0x31   :  { %p150_p7 = scmp.ne.s32.totalorder %s263_s2, %s149_s14  ;;  %p153_p8 = scmp.lt.u32.totalorder %s149_s14, %s263_s2 }
  0x33   :  { %p155_p9 = pnand %p153_p8, %p150_p7 }
  0x35   :  { %158 = shalt.err (!%p155_p9)
}
  0x36   :  { %68 = dma.vmem_to_hbm [thread:$0]  %s66_s9, 128, %s263_s2, [#allocation4]   ;;  %58 = vst [vmem:[#allocation8] sm:$0xff] %v56_v14 }
  0x37   :  { %s159_s21 = scalar_lea.vmem %s76_s11, 128  ;;  %p164_p11 = scmp.lt.s32.totalorder %s76_s11, %s76_s11 }
  0x38   :  { %p160_p10 = scmp.ne.s32.totalorder %s76_s11, %s159_s21  ;;  %p165_p12 = scmp.lt.s32.totalorder %s159_s21, %s159_s21 }
  0x3a   :  { %p166_p13 = por %p165_p12, %p164_p11 }
  0x3c   :  { %p167_p0 = pnand %p166_p13, %p160_p10 }
  0x3e   :  { %170 = shalt.err (!%p167_p0)
}
  0x3f   :  { %s171_s24 = scalar_lea.hbm %s264_s3, 128 }
  0x40   :  { %p172_p1 = scmp.ne.s32.totalorder %s264_s3, %s171_s24  ;;  %p175_p2 = scmp.lt.u32.totalorder %s171_s24, %s264_s3 }
  0x42   :  { %p177_p3 = pnand %p175_p2, %p172_p1 }
  0x44   :  { %180 = shalt.err (!%p177_p3)
}
  0x45   :  { %78 = dma.vmem_to_hbm [thread:$0]  %s76_s11, 128, %s264_s3, [#allocation9]  }
  0x46   :  { %185 = dma.done.wait [#allocation4], 128  }
  0x47   :  { %186 = vsyncadd [#allocation4], 4294967168 }
  0x48   :  { %187 = dma.done.wait [#allocation9], 128  }
  0x49   :  { %188 = vsyncadd [#allocation9], 4294967168 }
  0x4a   :  { %85 = vsyncpa [#allocation3], 1 }
  0x4b   :  { %86 = vsyncpa [#allocation6], 1 }
  0x4c   :  { %87 = vsyncpa [#allocation4], 1 }
  0x4d   :  { %88 = vsyncpa [#allocation9], 1 }

</bundles_post_ra>
